<compile_context>
chip_gen: v7x
topology: tpu7x:2x2x1
jax: 0.10.0
libtpu: 0.0.40
codegen_flags: <defaults>
</compile_context>

<pallas_src>
import functools

import jax
import jax.numpy as jnp
from jax.experimental import pallas as pl
from jax.experimental.pallas import tpu as pltpu

LOG_STD_MIN = -20.0
LOG_STD_MAX = 2.0

_LANE = 128
_SUBLANE = 8
_MAX_BATCH_TILE = 1024


def _round_up(x, m):
    return ((x + m - 1) // m) * m


def gaussian_policy_kernel(x_ref, w1_ref, b1_ref, w2_ref, b2_ref,
                           wh_ref, bh_ref, mean_ref, log_std_ref, *,
                           action_dim):
    """One batch tile of the policy MLP with a fused (mean | log_std) head.

    Weights are bf16 (MXU-native feeds); accumulation / bias / ReLU / clamp
    are f32.  The fused head produces a lane-padded (TB, P) value; only the
    real columns are stored: cols [0, A) -> mean, cols [A, 2A) -> clamped
    log_std.  Narrow (TB, A) stores keep HBM writeback at 2*A*4 bytes/row.
    """
    cd = w1_ref.dtype  # compute dtype for MXU inputs (bf16)
    A = action_dim

    x = x_ref[...].astype(cd)                                          # (TB, S)

    # Hidden layer 1: Linear + ReLU (MXU matmul, f32 accumulate).
    h1 = jnp.dot(x, w1_ref[...], preferred_element_type=jnp.float32)
    h1 = jnp.maximum(h1 + b1_ref[...], 0.0)                            # (TB, Hp)

    # Hidden layer 2: Linear + ReLU.
    h2 = jnp.dot(h1.astype(cd), w2_ref[...],
                 preferred_element_type=jnp.float32)
    h2 = jnp.maximum(h2 + b2_ref[...], 0.0)                            # (TB, Hp)

    # Fused head: one matmul for [mean | log_std | pad].
    head = jnp.dot(h2.astype(cd), wh_ref[...],
                   preferred_element_type=jnp.float32)
    head = head + bh_ref[...]                                          # (TB, P)

    mean_ref[...] = head[:, :A]
    log_std_ref[...] = jnp.clip(head[:, A:2 * A], LOG_STD_MIN, LOG_STD_MAX)


def pack_params(params, *, compute_dtype=jnp.bfloat16):
    """One-time weight packing (hoisted off the per-call hot path).

    - casts matmul weights to bf16 (MXU feeds), keeps biases f32,
    - fuses the mean/log_std heads into one (Hp, 128) weight + (1, 128) bias,
    - zero-pads the hidden dim up to a multiple of 128 (lane-dense h1/h2);
      numerically neutral since the pad weights/biases are zero.
    """
    S, H = params["w1"].shape
    A = params["wm"].shape[1]
    Hp = _round_up(H, _LANE)
    P = _round_up(2 * A, _LANE)
    cd = compute_dtype

    w1 = jnp.zeros((S, Hp), cd).at[:, :H].set(params["w1"].astype(cd))
    b1 = jnp.zeros((1, Hp), jnp.float32).at[:, :H].set(
        jnp.reshape(params["b1"].astype(jnp.float32), (1, H)))
    w2 = jnp.zeros((Hp, Hp), cd).at[:H, :H].set(params["w2"].astype(cd))
    b2 = jnp.zeros((1, Hp), jnp.float32).at[:, :H].set(
        jnp.reshape(params["b2"].astype(jnp.float32), (1, H)))
    wh = jnp.zeros((Hp, P), cd).at[:H, :2 * A].set(
        jnp.concatenate([params["wm"], params["wls"]], axis=1).astype(cd))
    bh = jnp.zeros((1, P), jnp.float32).at[:, :2 * A].set(
        jnp.concatenate([params["bm"], params["bls"]], axis=1)
        .astype(jnp.float32).reshape(1, 2 * A))

    packed = {"w1": w1, "b1": b1, "w2": w2, "b2": b2, "wh": wh, "bh": bh,
              "state_dim": S, "action_dim": A}
    return packed


def gaussian_policy_forward(state, packed):
    """state: (B, state_dim) f32. packed: output of pack_params()."""
    B, S = state.shape
    A = packed["action_dim"]
    assert S == packed["state_dim"]
    Hp = packed["w1"].shape[1]
    P = packed["wh"].shape[1]

    # ---- batch tiling: weights VMEM-resident, state/outputs auto-pipelined --
    if B <= _MAX_BATCH_TILE:
        TB = _round_up(B, _SUBLANE)
        Bp = TB
    else:
        # Bound padding waste: split into the minimal number of <=cap tiles.
        n_tiles = -(-B // _MAX_BATCH_TILE)
        TB = _round_up(-(-B // n_tiles), _SUBLANE)
        Bp = TB * n_tiles
    if Bp != B:
        state = jnp.pad(state, ((0, Bp - B), (0, 0)))

    # Constant index maps keep weights/biases resident in VMEM across the grid.
    # (They are still double-buffered by default; tiny footprint, so fine.)
    const = lambda shape: pl.BlockSpec(shape, lambda i: (0, 0))

    mean, log_std = pl.pallas_call(
        functools.partial(gaussian_policy_kernel, action_dim=A),
        out_shape=(jax.ShapeDtypeStruct((Bp, A), jnp.float32),
                   jax.ShapeDtypeStruct((Bp, A), jnp.float32)),
        grid=(Bp // TB,),
        in_specs=[
            pl.BlockSpec((TB, S), lambda i: (i, 0)),   # state: tiled over batch
            const((S, Hp)), const((1, Hp)),            # layer 1
            const((Hp, Hp)), const((1, Hp)),           # layer 2
            const((Hp, P)), const((1, P)),             # fused mean/log_std head
        ],
        out_specs=(pl.BlockSpec((TB, A), lambda i: (i, 0)),
                   pl.BlockSpec((TB, A), lambda i: (i, 0))),
        compiler_params=pltpu.CompilerParams(
            dimension_semantics=("parallel",),
            vmem_limit_bytes=32 * 1024 * 1024),
    )(state, packed["w1"], packed["b1"], packed["w2"], packed["b2"],
      packed["wh"], packed["bh"])

    if Bp != B:
        mean = mean[:B]
        log_std = log_std[:B]
    return mean, log_std


def init_params(key, state_dim, action_dim, hidden_dim):
    """Deterministic init matching the PyTorch module's _init_weights."""
    k1, k2, k3, k4 = jax.random.split(key, 4)

    # kaiming_normal_(nonlinearity='relu'), mode='fan_in': std = sqrt(2/fan_in)
    w1 = jax.random.normal(k1, (state_dim, hidden_dim), jnp.float32) * jnp.sqrt(2.0 / state_dim)
    w2 = jax.random.normal(k2, (hidden_dim, hidden_dim), jnp.float32) * jnp.sqrt(2.0 / hidden_dim)

    # xavier_uniform_ with gain = calculate_gain('tanh') = 5/3
    gain = 5.0 / 3.0
    bound = gain * jnp.sqrt(6.0 / (hidden_dim + action_dim))
    wm = jax.random.uniform(k3, (hidden_dim, action_dim), jnp.float32, -bound, bound)
    wls = jax.random.uniform(k4, (hidden_dim, action_dim), jnp.float32, -bound, bound)

    return {
        "w1": w1, "b1": jnp.zeros((1, hidden_dim), jnp.float32),
        "w2": w2, "b2": jnp.zeros((1, hidden_dim), jnp.float32),
        "wm": wm, "bm": jnp.zeros((1, action_dim), jnp.float32),
        "wls": wls, "bls": jnp.zeros((1, action_dim), jnp.float32),
    }


def reference_forward(state, params, compute_dtype=jnp.bfloat16):
    """Pure-JAX reference with the same bf16-feed / f32-accumulate recipe."""
    cd = compute_dtype
    w1 = params["w1"].astype(cd)
    w2 = params["w2"].astype(cd)
    wm = params["wm"].astype(cd)
    wls = params["wls"].astype(cd)
    h1 = jnp.maximum(
        jnp.dot(state.astype(cd), w1, preferred_element_type=jnp.float32)
        + params["b1"], 0.0)
    h2 = jnp.maximum(
        jnp.dot(h1.astype(cd), w2, preferred_element_type=jnp.float32)
        + params["b2"], 0.0)
    mean = jnp.dot(h2.astype(cd), wm, preferred_element_type=jnp.float32) + params["bm"]
    log_std = jnp.clip(
        jnp.dot(h2.astype(cd), wls, preferred_element_type=jnp.float32) + params["bls"],
        LOG_STD_MIN, LOG_STD_MAX)
    return mean, log_std


if __name__ == "__main__":
    key = jax.random.PRNGKey(0)
    k_state, k_params, k_big = jax.random.split(key, 3)

    B, STATE_DIM, ACTION_DIM, HIDDEN_DIM = 8, 16, 8, 32

    state = jax.random.normal(k_state, (B, STATE_DIM), jnp.float32)
    params = init_params(k_params, STATE_DIM, ACTION_DIM, HIDDEN_DIM)
    packed = pack_params(params)   # one-time packing, off the hot path
    jax.block_until_ready(packed["wh"])

    mean, log_std = gaussian_policy_forward(state, packed)
    jax.block_until_ready((mean, log_std))

    ref_mean, ref_log_std = reference_forward(state, params)
    assert mean.shape == (B, ACTION_DIM) and log_std.shape == (B, ACTION_DIM)
    assert jnp.allclose(mean, ref_mean, atol=1e-2, rtol=1e-2), \
        float(jnp.max(jnp.abs(mean - ref_mean)))
    assert jnp.allclose(log_std, ref_log_std, atol=1e-2, rtol=1e-2), \
        float(jnp.max(jnp.abs(log_std - ref_log_std)))
    assert float(jnp.max(log_std)) <= LOG_STD_MAX
    assert float(jnp.min(log_std)) >= LOG_STD_MIN

    # Exercise the multi-tile (grid > 1) path with batch padding and the
    # waste-bounded tile selection (B=2500 -> 3 tiles of 840 rows).
    B2 = 2500
    state2 = jax.random.normal(k_big, (B2, STATE_DIM), jnp.float32)
    mean2, log_std2 = gaussian_policy_forward(state2, packed)
    jax.block_until_ready((mean2, log_std2))
    ref_mean2, ref_log_std2 = reference_forward(state2, params)
    assert mean2.shape == (B2, ACTION_DIM) and log_std2.shape == (B2, ACTION_DIM)
    assert jnp.allclose(mean2, ref_mean2, atol=1e-2, rtol=1e-2)
    assert jnp.allclose(log_std2, ref_log_std2, atol=1e-2, rtol=1e-2)

    # TODO(synk): sample() (Normal rsample + tanh squash + log_prob) is
    # RNG-driven and outside the forward hot path; only forward() is in-kernel.
    print("KERNEL_OK")
</pallas_src>

<mosaic_0001>
module attributes {stable_mosaic.version = 11 : i64} {
  func.func @gaussian_policy_kernel(%arg0: i32, %arg1: memref<8x16xf32, #tpu.memory_space<vmem>>, %arg2: memref<16x128xbf16, #tpu.memory_space<vmem>>, %arg3: memref<1x128xf32, #tpu.memory_space<vmem>>, %arg4: memref<128x128xbf16, #tpu.memory_space<vmem>>, %arg5: memref<1x128xf32, #tpu.memory_space<vmem>>, %arg6: memref<128x128xbf16, #tpu.memory_space<vmem>>, %arg7: memref<1x128xf32, #tpu.memory_space<vmem>>, %arg8: memref<8x8xf32, #tpu.memory_space<vmem>>, %arg9: memref<8x8xf32, #tpu.memory_space<vmem>>) attributes {dimension_semantics = [#tpu.dimension_semantics<parallel>], iteration_bounds = array<i64: 1>, scalar_prefetch = 0 : i64, scratch_operands = 0 : i64, tpu.core_type = #tpu.core_type<tc>, window_params = [{transform_indices = @transform_0, window_bounds = array<i64: 8, 16>}, {pipeline_mode = #tpu.pipeline_mode<synchronous>, transform_indices = @transform_1, window_bounds = array<i64: 16, 128>}, {pipeline_mode = #tpu.pipeline_mode<synchronous>, transform_indices = @transform_2, window_bounds = array<i64: 1, 128>}, {pipeline_mode = #tpu.pipeline_mode<synchronous>, transform_indices = @transform_3, window_bounds = array<i64: 128, 128>}, {pipeline_mode = #tpu.pipeline_mode<synchronous>, transform_indices = @transform_4, window_bounds = array<i64: 1, 128>}, {pipeline_mode = #tpu.pipeline_mode<synchronous>, transform_indices = @transform_5, window_bounds = array<i64: 128, 128>}, {pipeline_mode = #tpu.pipeline_mode<synchronous>, transform_indices = @transform_6, window_bounds = array<i64: 1, 128>}, {transform_indices = @transform_7, window_bounds = array<i64: 8, 8>}, {transform_indices = @transform_8, window_bounds = array<i64: 8, 8>}]} {
    %c0 = arith.constant 0 : index
    %c0_0 = arith.constant 0 : index
    %0 = vector.load %arg1[%c0, %c0_0] : memref<8x16xf32, #tpu.memory_space<vmem>>, vector<8x16xf32>
    %1 = arith.truncf %0 : vector<8x16xf32> to vector<8x16xbf16>
    %c0_1 = arith.constant 0 : index
    %c0_2 = arith.constant 0 : index
    %2 = vector.load %arg2[%c0_1, %c0_2] : memref<16x128xbf16, #tpu.memory_space<vmem>>, vector<16x128xbf16>
    %cst = arith.constant dense<0.000000e+00> : vector<8x128xf32>
    %3 = tpu.matmul %1, %2, %cst {dimension_numbers = #tpu.dot_dimension_numbers<[1], [0], [0], [1], [0, 0, 1, 1], [], []>} : vector<8x16xbf16>, vector<16x128xbf16>, vector<8x128xf32> -> vector<8x128xf32>
    %c0_3 = arith.constant 0 : index
    %c0_4 = arith.constant 0 : index
    %4 = vector.load %arg3[%c0_3, %c0_4] : memref<1x128xf32, #tpu.memory_space<vmem>>, vector<1x128xf32>
    %5 = vector.broadcast %4 : vector<1x128xf32> to vector<8x128xf32>
    %6 = arith.addf %3, %5 : vector<8x128xf32>
    %cst_5 = arith.constant 0.000000e+00 : f32
    %7 = vector.broadcast %cst_5 : f32 to vector<8x128xf32>
    %8 = arith.maximumf %6, %7 : vector<8x128xf32>
    %9 = arith.truncf %8 : vector<8x128xf32> to vector<8x128xbf16>
    %c0_6 = arith.constant 0 : index
    %c0_7 = arith.constant 0 : index
    %10 = vector.load %arg4[%c0_6, %c0_7] : memref<128x128xbf16, #tpu.memory_space<vmem>>, vector<128x128xbf16>
    %cst_8 = arith.constant dense<0.000000e+00> : vector<8x128xf32>
    %11 = tpu.matmul %9, %10, %cst_8 {dimension_numbers = #tpu.dot_dimension_numbers<[1], [0], [0], [1], [0, 0, 1, 1], [], []>} : vector<8x128xbf16>, vector<128x128xbf16>, vector<8x128xf32> -> vector<8x128xf32>
    %c0_9 = arith.constant 0 : index
    %c0_10 = arith.constant 0 : index
    %12 = vector.load %arg5[%c0_9, %c0_10] : memref<1x128xf32, #tpu.memory_space<vmem>>, vector<1x128xf32>
    %13 = vector.broadcast %12 : vector<1x128xf32> to vector<8x128xf32>
    %14 = arith.addf %11, %13 : vector<8x128xf32>
    %cst_11 = arith.constant 0.000000e+00 : f32
    %15 = vector.broadcast %cst_11 : f32 to vector<8x128xf32>
    %16 = arith.maximumf %14, %15 : vector<8x128xf32>
    %17 = arith.truncf %16 : vector<8x128xf32> to vector<8x128xbf16>
    %c0_12 = arith.constant 0 : index
    %c0_13 = arith.constant 0 : index
    %18 = vector.load %arg6[%c0_12, %c0_13] : memref<128x128xbf16, #tpu.memory_space<vmem>>, vector<128x128xbf16>
    %cst_14 = arith.constant dense<0.000000e+00> : vector<8x128xf32>
    %19 = tpu.matmul %17, %18, %cst_14 {dimension_numbers = #tpu.dot_dimension_numbers<[1], [0], [0], [1], [0, 0, 1, 1], [], []>} : vector<8x128xbf16>, vector<128x128xbf16>, vector<8x128xf32> -> vector<8x128xf32>
    %c0_15 = arith.constant 0 : index
    %c0_16 = arith.constant 0 : index
    %20 = vector.load %arg7[%c0_15, %c0_16] : memref<1x128xf32, #tpu.memory_space<vmem>>, vector<1x128xf32>
    %21 = vector.broadcast %20 : vector<1x128xf32> to vector<8x128xf32>
    %22 = arith.addf %19, %21 : vector<8x128xf32>
    %23 = vector.extract_strided_slice %22 {offsets = [0, 0], sizes = [8, 8], strides = [1, 1]} : vector<8x128xf32> to vector<8x8xf32>
    %c0_17 = arith.constant 0 : index
    %c0_18 = arith.constant 0 : index
    %24 = vector.load %arg8[%c0_17, %c0_18] : memref<8x8xf32, #tpu.memory_space<vmem>>, vector<8x8xf32>
    tpu.vector_store %arg8[%c0_17, %c0_18], %23 {strides = array<i32>} : memref<8x8xf32, #tpu.memory_space<vmem>>, vector<8x8xf32>,
    %25 = vector.extract_strided_slice %22 {offsets = [0, 8], sizes = [8, 8], strides = [1, 1]} : vector<8x128xf32> to vector<8x8xf32>
    %cst_19 = arith.constant -2.000000e+01 : f32
    %cst_20 = arith.constant 2.000000e+00 : f32
    %26 = vector.broadcast %cst_19 : f32 to vector<8x8xf32>
    %27 = arith.maximumf %26, %25 : vector<8x8xf32>
    %28 = vector.broadcast %cst_20 : f32 to vector<8x8xf32>
    %29 = arith.minimumf %28, %27 : vector<8x8xf32>
    %c0_21 = arith.constant 0 : index
    %c0_22 = arith.constant 0 : index
    %30 = vector.load %arg9[%c0_21, %c0_22] : memref<8x8xf32, #tpu.memory_space<vmem>>, vector<8x8xf32>
    tpu.vector_store %arg9[%c0_21, %c0_22], %29 {strides = array<i32>} : memref<8x8xf32, #tpu.memory_space<vmem>>, vector<8x8xf32>,
    return
  }
  func.func @transform_0(%arg0: i32) -> (i32, i32) {
    %c0_i32 = arith.constant 0 : i32
    %c0_i32_0 = arith.constant 0 : i32
    return %arg0, %c0_i32 : i32, i32
  }
  func.func @transform_1(%arg0: i32) -> (i32, i32) {
    %c0_i32 = arith.constant 0 : i32
    %c0_i32_0 = arith.constant 0 : i32
    %c0_i32_1 = arith.constant 0 : i32
    return %c0_i32, %c0_i32_0 : i32, i32
  }
  func.func @transform_2(%arg0: i32) -> (i32, i32) {
    %c0_i32 = arith.constant 0 : i32
    %c0_i32_0 = arith.constant 0 : i32
    %c0_i32_1 = arith.constant 0 : i32
    return %c0_i32, %c0_i32_0 : i32, i32
  }
  func.func @transform_3(%arg0: i32) -> (i32, i32) {
    %c0_i32 = arith.constant 0 : i32
    %c0_i32_0 = arith.constant 0 : i32
    %c0_i32_1 = arith.constant 0 : i32
    return %c0_i32, %c0_i32_0 : i32, i32
  }
  func.func @transform_4(%arg0: i32) -> (i32, i32) {
    %c0_i32 = arith.constant 0 : i32
    %c0_i32_0 = arith.constant 0 : i32
    %c0_i32_1 = arith.constant 0 : i32
    return %c0_i32, %c0_i32_0 : i32, i32
  }
  func.func @transform_5(%arg0: i32) -> (i32, i32) {
    %c0_i32 = arith.constant 0 : i32
    %c0_i32_0 = arith.constant 0 : i32
    %c0_i32_1 = arith.constant 0 : i32
    return %c0_i32, %c0_i32_0 : i32, i32
  }
  func.func @transform_6(%arg0: i32) -> (i32, i32) {
    %c0_i32 = arith.constant 0 : i32
    %c0_i32_0 = arith.constant 0 : i32
    %c0_i32_1 = arith.constant 0 : i32
    return %c0_i32, %c0_i32_0 : i32, i32
  }
  func.func @transform_7(%arg0: i32) -> (i32, i32) {
    %c0_i32 = arith.constant 0 : i32
    %c0_i32_0 = arith.constant 0 : i32
    return %arg0, %c0_i32 : i32, i32
  }
  func.func @transform_8(%arg0: i32) -> (i32, i32) {
    %c0_i32 = arith.constant 0 : i32
    %c0_i32_0 = arith.constant 0 : i32
    return %arg0, %c0_i32 : i32, i32
  }
}

</mosaic_0001>

<bundles_post_ra>
// kernel: tpu_custom_call.1
= control target key start
LH: loop header
LB: loop body
LE: loop exit
PB: predicated region body
PF: predicated region fallthrough
CT: control target
= control target key end

     0   :  { %14 = vsyncpa [#allocation3], 0  ;;  %s836_s0 = inlined_call_operand.hbm [shape: f32[8,16], index: 0, kind: input, shape index: {}]   ;;  %s837_s1 = inlined_call_operand.hbm [shape: bf16[16,128], index: 1, kind: input, shape index: {}]   ;;  %s838_s2 = inlined_call_operand.vmem [shape: f32[1,128], index: 2, kind: input, shape index: {}]   ;;  %s839_s3 = inlined_call_operand.hbm [shape: bf16[128,128], index: 3, kind: input, shape index: {}]   ;;  %s840_s4 = inlined_call_operand.vmem [shape: f32[1,128], index: 4, kind: input, shape index: {}]   ;;  %s841_s5 = inlined_call_operand.hbm [shape: bf16[128,128], index: 5, kind: input, shape index: {}]   ;;  %s842_s6 = inlined_call_operand.vmem [shape: f32[1,128], index: 6, kind: input, shape index: {}]   ;;  %s843_s7 = inlined_call_operand.hbm [shape: f32[8,8], index: 7, kind: output, shape index: {0}]   ;;  %s844_s8 = inlined_call_operand.hbm [shape: f32[8,8], index: 8, kind: output, shape index: {1}]  }
   0x1   :  { %15 = vsyncpa [#allocation6], 0 }
   0x2   :  { %16 = vsyncpa [#allocation9], 0 }
   0x3   :  { %17 = vsyncpa [#allocation4], 0 }
   0x4   :  { %18 = vsyncpa [#allocation12], 0  ;;  %s668_s27 = smov [#allocation5]   ;;  %s526_s9 = scalar_lea.hbm %s837_s1, 128 }
   0x5   :  { %s34_s28 = sshll.u32 %s668_s27, 4  ;;  %p527_p0 = scmp.ne.s32.totalorder %s837_s1, %s526_s9  ;;  %s35_s28 = int_to_ptr.vmem [resolvable:$true] %s34_s28 }
   0x6   :  { %p530_p1 = scmp.lt.u32.totalorder %s526_s9, %s837_s1 }
   0x8   :  { %p532_p2 = pnand %p530_p1, %p527_p0 }
   0xa   :  { %535 = shalt.err (!%p532_p2)
}
   0xb   :  { %s536_s14 = scalar_lea.vmem %s35_s28, 128  ;;  %p541_p4 = scmp.lt.s32.totalorder %s35_s28, %s35_s28 }
   0xc   :  { %p537_p3 = scmp.ne.s32.totalorder %s35_s28, %s536_s14  ;;  %p542_p5 = scmp.lt.s32.totalorder %s536_s14, %s536_s14 }
   0xe   :  { %p543_p6 = por %p542_p5, %p541_p4 }
  0x10   :  { %p544_p7 = pnand %p543_p6, %p537_p3 }
  0x12   :  { %547 = shalt.err (!%p544_p7)
}
  0x13   :  { %s669_s15 = smov 64   ;;  %s670_s16 = smov 4  }
  0x14   :  { %40 = dma.hbm_to_vmem [thread:$0]  %s837_s1, 128, %s35_s28, [#allocation6], %s669_s15, %s669_s15, %s670_s16  }
  0x15   :  { %s671_s19 = smov [#allocation2]   ;;  %s672_s21 = smov [#allocation7]  }
  0x16   :  { %s25_s20 = sshll.u32 %s671_s19, 4  ;;  %s48_s22 = sshll.u32 %s672_s21, 4  ;;  %s26_s20 = int_to_ptr.vmem [resolvable:$true] %s25_s20  ;;  %s49_s22 = int_to_ptr.vmem [resolvable:$true] %s48_s22 }
  0x17   :  { %s548_s25 = scalar_lea.hbm %s836_s0, 128 }
  0x18   :  { %p549_p8 = scmp.ne.s32.totalorder %s836_s0, %s548_s25  ;;  %p552_p9 = scmp.lt.u32.totalorder %s548_s25, %s836_s0 }
  0x1a   :  { %p554_p10 = pnand %p552_p9, %p549_p8 }
  0x1c   :  { %557 = shalt.err (!%p554_p10)
}
  0x1d   :  { %s558_s1 = scalar_lea.vmem %s26_s20, 128  ;;  %p563_p12 = scmp.lt.s32.totalorder %s26_s20, %s26_s20 }
  0x1e   :  { %p559_p11 = scmp.ne.s32.totalorder %s26_s20, %s558_s1  ;;  %p564_p13 = scmp.lt.s32.totalorder %s558_s1, %s558_s1 }
  0x20   :  { %p565_p0 = por %p564_p13, %p563_p12 }
  0x22   :  { %p566_p1 = pnand %p565_p0, %p559_p11 }
  0x24   :  { %569 = shalt.err (!%p566_p1)
}
  0x25   :  { %28 = dma.hbm_to_vmem [thread:$0]  %s836_s0, 128, %s26_s20, [#allocation3]  }
  0x26   :  { %s570_s12 = scalar_lea.hbm %s839_s3, 1024 }
  0x27   :  { %p571_p2 = scmp.ne.s32.totalorder %s839_s3, %s570_s12  ;;  %p574_p3 = scmp.lt.u32.totalorder %s570_s12, %s839_s3 }
  0x29   :  { %p576_p4 = pnand %p574_p3, %p571_p2 }
  0x2b   :  { %579 = shalt.err (!%p576_p4)
}
  0x2c   :  { %s580_s19 = scalar_lea.vmem %s49_s22, 1024  ;;  %p585_p6 = scmp.lt.s32.totalorder %s49_s22, %s49_s22 }
  0x2d   :  { %p581_p5 = scmp.ne.s32.totalorder %s49_s22, %s580_s19  ;;  %p586_p7 = scmp.lt.s32.totalorder %s580_s19, %s580_s19 }
  0x2f   :  { %p587_p8 = por %p586_p7, %p585_p6 }
  0x31   :  { %p588_p9 = pnand %p587_p8, %p581_p5 }
  0x33   :  { %591 = shalt.err (!%p588_p9)
}
  0x34   :  { %54 = dma.hbm_to_vmem [thread:$0]  %s839_s3, 1024, %s49_s22, [#allocation6], %s669_s15, %s669_s15, %s670_s16  }
  0x35   :  { %s673_s21 = smov [#allocation8]   ;;  %s592_s26 = scalar_lea.hbm %s841_s5, 1024 }
  0x36   :  { %s62_s23 = sshll.u32 %s673_s21, 4  ;;  %p593_p10 = scmp.ne.s32.totalorder %s841_s5, %s592_s26  ;;  %s63_s23 = int_to_ptr.vmem [resolvable:$true] %s62_s23 }
  0x37   :  { %p596_p11 = scmp.lt.u32.totalorder %s592_s26, %s841_s5 }
  0x39   :  { %p598_p12 = pnand %p596_p11, %p593_p10 }
  0x3b   :  { %601 = shalt.err (!%p598_p12)
}
  0x3c   :  { %s602_s28 = scalar_lea.vmem %s63_s23, 1024  ;;  %p607_p0 = scmp.lt.s32.totalorder %s63_s23, %s63_s23 }
  0x3d   :  { %p603_p13 = scmp.ne.s32.totalorder %s63_s23, %s602_s28  ;;  %p608_p1 = scmp.lt.s32.totalorder %s602_s28, %s602_s28 }
  0x3f   :  { %p609_p2 = por %p608_p1, %p607_p0 }
  0x41   :  { %p610_p3 = pnand %p609_p2, %p603_p13 }
  0x43   :  { %613 = shalt.err (!%p610_p3)
}
  0x44   :  { %68 = dma.hbm_to_vmem [thread:$0]  %s841_s5, 1024, %s63_s23, [#allocation9], %s669_s15, %s669_s15, %s670_s16  }
  0x45   :  { %658 = dma.done.wait [#allocation3], 128  }
  0x46   :  { %659 = vsyncadd [#allocation3], 4294967168 }
  0x47   :  { %660 = dma.done.wait [#allocation6], 1152  }
  0x48   :  { %661 = vsyncadd [#allocation6], 4294966144 }
  0x49   :  { %662 = dma.done.wait [#allocation9], 1024  }
  0x4a   :  { %663 = vsyncadd [#allocation9], 4294966272  ;;  %v674_v0 = vmov 0.0   ;;  %vm675_vm0 = vmmov 0   ;;  %v509_v1 = vld [vmem:[#allocation5] sm:$0xff]   ;;  %v84_v2 = vld [vmem:[#allocation2] sm:$0xff] }
  0x4b   :  { %452 = vmatprep.subr.bf16.mxu0 %v674_v0  ;;  %454 = vmatprep.mubr.msk.bf16.mxu0 %vm675_vm0, %v674_v0  ;;  %v85_v3 = vpack.c.bf16 %v84_v2, %v84_v2  ;;  %vm101_vm1 = vcmask 130048   ;;  %v510_v4 = vld [vmem:[#allocation7] sm:$0xff]   ;;  %v511_v5 = vld [vmem:[#allocation7 + $0x8] sm:$0xff]   ;;  %v512_v6 = vld [vmem:[#allocation7 + $0x10] sm:$0xff]   ;;  %s676_s11 = smov [#allocation10]   ;;  %vm371_vm2 = vcmask 64512  }
  0x4c   :  { %458 = vmatprep.subr.bf16.mxu1 %v674_v0  ;;  %474 = vmatprep.mubr.msk.bf16.mxu1 %vm675_vm0, %v674_v0  ;;  %v513_v7 = vld [vmem:[#allocation7 + $0x18] sm:$0xff]   ;;  %v514_v8 = vld [vmem:[#allocation7 + $0x20] sm:$0xff]   ;;  %v515_v9 = vld [vmem:[#allocation7 + $0x28] sm:$0xff]   ;;  %s386_s12 = sshll.u32 %s676_s11, 4  ;;  %s387_s12 = int_to_ptr.vmem [resolvable:$true] %s386_s12 }
  0x4d   :  { %453 = vmatpush3.bf16.msra.mxu0 %v509_v1  ;;  %459 = vmatpush3.bf16.msra.mxu1 %v510_v4  ;;  %v516_v10 = vld [vmem:[#allocation7 + $0x30] sm:$0xff]   ;;  %v517_v11 = vld [vmem:[#allocation7 + $0x38] sm:$0xff]   ;;  %v518_v12 = vld [vmem:[#allocation8] sm:$0xff]   ;;  %p619_p5 = scmp.lt.s32.totalorder %s387_s12, %s387_s12 }
  0x4e   :  { %478 = vmatprep.subr.bf16.mxu0 %v674_v0  ;;  %460 = vmatprep.subr.bf16.mxu1 %v674_v0  ;;  %v519_v13 = vld [vmem:[#allocation8 + $0x8] sm:$0xff]   ;;  %v520_v14 = vld [vmem:[#allocation8 + $0x10] sm:$0xff]   ;;  %v521_v15 = vld [vmem:[#allocation8 + $0x18] sm:$0xff]  }
  0x4f   :  { %v522_v16 = vld [vmem:[#allocation8 + $0x20] sm:$0xff]   ;;  %v523_v17 = vld [vmem:[#allocation8 + $0x28] sm:$0xff]   ;;  %v411_v18 = vld [vmem:[%s838_s2] ss:$0 sm:$0xff] }
  0x50   :  { %455 = vmatmul.mubr.msk.bf16.vlgmr.msra.gmra.mrb[0].mxu0 %vm101_vm1, %v85_v3  ;;  %v524_v26 = vld [vmem:[#allocation8 + $0x30] sm:$0xff]   ;;  %v525_v27 = vld [vmem:[#allocation8 + $0x38] sm:$0xff]  }
  0x51   :  { %494 = vmatprep.mubr.msk.bf16.mxu0 %vm675_vm0, %v674_v0  ;;  %461 = vmatpush3.bf16.msra.mxu1 %v511_v5  ;;  %v414_v28 = vld [vmem:[%s840_s4] ss:$0 sm:$0xff]  ;;  %s614_s4 = scalar_lea.vmem %s387_s12, 128 }
  0x52   :  { %462 = vmatprep.subr.bf16.mxu1 %v674_v0  ;;  %479 = vmatpush3.bf16.msra.mxu0 %v518_v12  ;;  %v423_v36 = vld [vmem:[%s842_s6] ss:$0 sm:$0xff]  ;;  %p615_p4 = scmp.ne.s32.totalorder %s387_s12, %s614_s4  ;;  %p620_p6 = scmp.lt.s32.totalorder %s614_s4, %s614_s4 }
  0x53   :  { %480 = vmatprep.subr.bf16.mxu0 %v674_v0 }
  0x54   :  { %p621_p7 = por %p620_p6, %p619_p5 }
  0x55   :  { %463 = vmatpush3.bf16.msra.mxu1 %v512_v6 }
  0x56   :  { %464 = vmatprep.subr.bf16.mxu1 %v674_v0  ;;  %481 = vmatpush3.bf16.msra.mxu0 %v519_v13  ;;  %p622_p8 = pnand %p621_p7, %p615_p4 }
  0x57   :  { %482 = vmatprep.subr.bf16.mxu0 %v674_v0 }
  0x59   :  { %465 = vmatpush3.bf16.msra.mxu1 %v513_v7 }
  0x5a   :  { %466 = vmatprep.subr.bf16.mxu1 %v674_v0  ;;  %483 = vmatpush3.bf16.msra.mxu0 %v520_v14 }
  0x5b   :  { %484 = vmatprep.subr.bf16.mxu0 %v674_v0 }
  0x5d   :  { %467 = vmatpush3.bf16.msra.mxu1 %v514_v8 }
  0x5e   :  { %468 = vmatprep.subr.bf16.mxu1 %v674_v0  ;;  %485 = vmatpush3.bf16.msra.mxu0 %v521_v15 }
  0x5f   :  { %486 = vmatprep.subr.bf16.mxu0 %v674_v0 }
  0x61   :  { %469 = vmatpush3.bf16.msra.mxu1 %v515_v9 }
  0x62   :  { %470 = vmatprep.subr.bf16.mxu1 %v674_v0  ;;  %487 = vmatpush3.bf16.msra.mxu0 %v522_v16 }
  0x63   :  { %488 = vmatprep.subr.bf16.mxu0 %v674_v0 }
  0x65   :  { %471 = vmatpush3.bf16.msra.mxu1 %v516_v10 }
  0x66   :  { %472 = vmatprep.subr.bf16.mxu1 %v674_v0  ;;  %489 = vmatpush3.bf16.msra.mxu0 %v523_v17 }
  0x67   :  { %490 = vmatprep.subr.bf16.mxu0 %v674_v0 }
  0x69   :  { %473 = vmatpush3.bf16.msra.mxu1 %v517_v11 }
  0x6a   :  { %491 = vmatpush3.bf16.msra.mxu0 %v524_v26 }
  0x6b   :  { %492 = vmatprep.subr.bf16.mxu0 %v674_v0 }
  0x6e   :  { %493 = vmatpush3.bf16.msra.mxu0 %v525_v27 }
 0x123   :  { %v139_v19 = vpop.f32.mrb[0].mxu0 }
 0x124   :  { %v140_v20 = vadd.f32 %v411_v18, %v139_v19  ;;  %v456_v21 = vpop.f32.mrb[1].mxu0 }
 0x125   :  { %v142_v22 = vpop.f32.mrb[2].mxu0 }
 0x126   :  { %v145_v23 = vmax.f32 %v140_v20, 0.0  ;;  %v457_v24 = vpop.f32.mrb[3].mxu0 }
 0x128   :  { %v146_v25 = vpack.c.bf16 %v145_v23, %v145_v23 }
 0x12a   :  { %475 = vmatmul.mubr.bf16.vlgmr.msra.gmra.mrb[0].mxu1 %v146_v25 }
 0x1fd   :  { %v252_v29 = vpop.f32.mrb[0].mxu1 }
 0x1fe   :  { %v253_v30 = vadd.f32 %v414_v28, %v252_v29  ;;  %v476_v31 = vpop.f32.mrb[1].mxu1 }
 0x1ff   :  { %v255_v32 = vpop.f32.mrb[2].mxu1 }
 0x200   :  { %v258_v33 = vmax.f32 %v253_v30, 0.0  ;;  %v477_v34 = vpop.f32.mrb[3].mxu1 }
 0x202   :  { %v259_v35 = vpack.c.bf16 %v258_v33, %v258_v33 }
 0x204   :  { %495 = vmatmul.mubr.bf16.vlgmr.msra.gmra.mrb[4].mxu0 %v259_v35 }
 0x2d7   :  { %v365_v37 = vpop.f32.mrb[4].mxu0 }
 0x2d8   :  { %v366_v38 = vadd.f32 %v423_v36, %v365_v37  ;;  %v496_v39 = vpop.f32.mrb[5].mxu0 }
 0x2d9   :  { %v368_v40 = vpop.f32.mrb[6].mxu0 }
 0x2da   :  { %v497_v41 = vpop.f32.mrb[7].mxu0  ;;  %v373_v42 = vmax.f32 %v366_v38, -20.0  ;;  %372 = vst.msk [vmem:[#allocation10] sm:$0xff] %vm371_vm2, %v366_v38 }
 0x2db   :  { %625 = shalt.err (!%p622_p8)
}
 0x2dc   :  { %s626_s14 = scalar_lea.hbm %s843_s7, 128 }
 0x2dd   :  { %p627_p9 = scmp.ne.s32.totalorder %s843_s7, %s626_s14  ;;  %p630_p10 = scmp.lt.u32.totalorder %s626_s14, %s843_s7 }
 0x2df   :  { %p632_p11 = pnand %p630_p10, %p627_p9 }
 0x2e1   :  { %635 = shalt.err (!%p632_p11)
}
 0x2e2   :  { %389 = dma.vmem_to_hbm [thread:$0]  %s387_s12, 128, %s843_s7, [#allocation4]   ;;  %v374_v43 = vmin.f32 %v373_v42, 2.0 }
 0x2e3   :  { %s677_s23 = smov 120   ;;  %s678_s24 = smov [#allocation11]  }
 0x2e4   :  { %376 = vrot.lane.b32.xlu0 %v374_v43, %s677_s23  ;;  %s396_s25 = sshll.u32 %s678_s24, 4  ;;  %s397_s25 = int_to_ptr.vmem [resolvable:$true] %s396_s25 }
 0x2e5   :  { %s636_s26 = scalar_lea.vmem %s397_s25, 128  ;;  %p641_p13 = scmp.lt.s32.totalorder %s397_s25, %s397_s25 }
 0x2e6   :  { %p637_p12 = scmp.ne.s32.totalorder %s397_s25, %s636_s26  ;;  %p642_p0 = scmp.lt.s32.totalorder %s636_s26, %s636_s26 }
 0x2e8   :  { %p643_p1 = por %p642_p0, %p641_p13 }
 0x2ea   :  { %p644_p2 = pnand %p643_p1, %p637_p12 }
 0x356   :  { %v377_v44 = vpop.permute.xlu0 %376 }
 0x357   :  { %379 = vst.msk [vmem:[#allocation11] sm:$0xff] %vm371_vm2, %v377_v44 }
 0x358   :  { %647 = shalt.err (!%p644_p2)
}
 0x359   :  { %s648_s7 = scalar_lea.hbm %s844_s8, 128 }
 0x35a   :  { %p649_p3 = scmp.ne.s32.totalorder %s844_s8, %s648_s7  ;;  %p652_p4 = scmp.lt.u32.totalorder %s648_s7, %s844_s8 }
 0x35c   :  { %p654_p5 = pnand %p652_p4, %p649_p3 }
 0x35e   :  { %657 = shalt.err (!%p654_p5)
}
 0x35f   :  { %399 = dma.vmem_to_hbm [thread:$0]  %s397_s25, 128, %s844_s8, [#allocation12]  }
 0x360   :  { %664 = dma.done.wait [#allocation4], 128  }
 0x361   :  { %665 = vsyncadd [#allocation4], 4294967168 }
 0x362   :  { %666 = dma.done.wait [#allocation12], 128  }
 0x363   :  { %667 = vsyncadd [#allocation12], 4294967168 }
 0x364   :  { %406 = vsyncpa [#allocation3], 1 }
 0x365   :  { %407 = vsyncpa [#allocation6], 1 }
 0x366   :  { %408 = vsyncpa [#allocation9], 1 }
 0x367   :  { %409 = vsyncpa [#allocation4], 1 }
 0x368   :  { %410 = vsyncpa [#allocation12], 1 }

</bundles_post_ra>
